<compile_context>
chip_gen: v7x
topology: tpu7x:2x2x1
jax: 0.10.0
libtpu: 0.0.40
codegen_flags: <defaults>
</compile_context>

<pallas_src>
import jax
import jax.numpy as jnp
import numpy as np
from jax.experimental import pallas as pl
from jax.experimental.pallas import tpu as pltpu


# ----------------------------------------------------------------------------
# Kernel: one batch tile, all V views fused along lanes — 6 plain matmuls.
# ----------------------------------------------------------------------------
def _pclad_kernel(x_ref, t_ref, w_in_ref, w_mid_ref, w_out_ref, o_ref):
    cd = x_ref.dtype                       # MXU input dtype (bf16 or f32)

    # All V subspace transforms at once: (bt, F) @ (F, V*F) -> (bt, V*F).
    a = jnp.dot(x_ref[...], t_ref[...], preferred_element_type=jnp.float32)

    # 5-layer bias-free ReLU MLP applied to every view via block-diagonal
    # replicated weights; narrow MXU inputs, f32 accumulation, f32 ReLU math.
    h = jnp.maximum(
        jnp.dot(a.astype(cd), w_in_ref[...],
                preferred_element_type=jnp.float32), 0.0)
    for j in range(w_mid_ref.shape[0]):    # static unrolled (3 mid layers)
        h = jnp.maximum(
            jnp.dot(h.astype(cd), w_mid_ref[j],
                    preferred_element_type=jnp.float32), 0.0)
    z = jnp.dot(h.astype(cd), w_out_ref[...],
                preferred_element_type=jnp.float32)          # (bt, V*R)

    # Lane-dense output, single unmasked full-block store; the wrapper does a
    # free (B, V*R) -> (B, V, R) reshape (row = [view0 | view1 | ...]).
    o_ref[...] = z.astype(o_ref.dtype)


# ----------------------------------------------------------------------------
# Wrapper helpers.
# ----------------------------------------------------------------------------
def _round_up(n, m):
    return ((n + m - 1) // m) * m


def _vmem_budget_bytes():
    """Scoped-VMEM budget: ~half of physical VMEM, clamped to [32, 96] MiB
    (v5e/v6e: 128 MiB physical -> 64 MiB; v7x: 64 MiB/TC -> 32 MiB)."""
    mib = 1024 * 1024
    try:
        cap = int(pltpu.get_tpu_info().vmem_capacity_bytes)
    except Exception:
        cap = 64 * mib                      # conservative default (v7x per-TC)
    return int(max(32 * mib, min(96 * mib, cap // 2)))


def _fit_batch_tile(bt, F, VF, VH, VR, in_bytes, resident_bytes, budget):
    """Shrink the (16-aligned) batch tile until the per-tile footprint
    (double-buffered x/out blocks + f32 activations + resident weights) fits
    comfortably inside the scoped-VMEM budget."""
    def usage(b):
        x_blk = 2 * b * F * in_bytes            # double-buffered input tile
        o_blk = 2 * b * VR * 4                  # double-buffered output tile
        acts = b * (VF + 2 * VH + VR) * 4       # f32 activation live set
        return x_blk + o_blk + acts + resident_bytes
    while bt > 16 and usage(bt) > 0.6 * budget:
        bt = max(16, (bt // 2) // 16 * 16)
    return bt


def _choose_tiling(B, batch_tile):
    """Pick (bt, n_tiles): 16-aligned tiles, and >=2 grid steps whenever the
    padded batch allows it so the 'parallel' axis feeds both v7x TensorCores."""
    B16 = _round_up(max(B, 1), 16)
    if B16 <= 16:
        return B16, 1
    if B16 <= 2 * batch_tile:
        return _round_up(pl.cdiv(B16, 2), 16), 2
    return batch_tile, pl.cdiv(B, batch_tile)


def _make_specs(bt, F, VF, VH, VR, n_mid, single_buffer_residents):
    # Resident operands have constant index maps; single-buffer them when the
    # JAX build supports pipeline_mode (halves their VMEM footprint).
    kw = {"pipeline_mode": pl.Buffered(1)} if single_buffer_residents else {}
    in_specs = [
        pl.BlockSpec((bt, F), lambda b: (b, 0)),              # x batch tile
        pl.BlockSpec((F, VF), lambda b: (0, 0), **kw),        # T_wide
        pl.BlockSpec((VF, VH), lambda b: (0, 0), **kw),       # block-diag W1
        pl.BlockSpec((n_mid, VH, VH), lambda b: (0, 0, 0), **kw),  # W2..W4
        pl.BlockSpec((VH, VR), lambda b: (0, 0), **kw),       # block-diag W5
    ]
    out_specs = pl.BlockSpec((bt, VR), lambda b: (b, 0))      # lane-dense out
    return in_specs, out_specs


# ----------------------------------------------------------------------------
# Public forward.
# ----------------------------------------------------------------------------
def pclad_encoder_forward(x, t_stack, enc_ws, *, mxu_dtype=jnp.bfloat16,
                          batch_tile=2048):
    """x: (B, F) f32; t_stack: (V, F, F) f32 per-view block-diagonal subspace
    transforms; enc_ws: [W1..W5] f32 bias-free MLP weights.

    Returns zs: (B, V, rep_dim) f32 in the PyTorch module's layout.

    Note: mxu_dtype=bfloat16 (default, fastest on v6e/v7x) feeds the MXU bf16
    inputs with f32 accumulation; pass mxu_dtype=jnp.float32 for an f32 mode
    matching the f32 PyTorch module.  Both paths are validated in __main__.
    """
    B, F = x.shape
    V = t_stack.shape[0]
    w_in, w2, w3, w4, w_out = enc_ws
    H = w_in.shape[1]
    R = w_out.shape[1]
    VF, VH, VR = V * F, V * H, V * R
    n_mid = 3

    # ---- Lane-fused weight layout (built once outside the kernel, tiny) ----
    # T_wide[:, v*F:(v+1)*F] = T_v   so   x @ T_wide = [x@T_0 | x@T_1 | ...].
    t_wide = jnp.transpose(t_stack, (1, 0, 2)).reshape(F, VF)
    eye_v = jnp.eye(V, dtype=jnp.float32)
    w_in_blk = jnp.kron(eye_v, w_in)                           # (V*F, V*H)
    w_mid_blk = jnp.stack([jnp.kron(eye_v, w) for w in (w2, w3, w4)], axis=0)
    w_out_blk = jnp.kron(eye_v, w_out)                         # (V*H, V*R)

    in_bytes = jnp.dtype(mxu_dtype).itemsize
    resident_bytes = 2 * in_bytes * (F * VF + VF * VH + n_mid * VH * VH + VH * VR)

    # ---- Tiling / VMEM budget ----------------------------------------------
    assert batch_tile % 16 == 0, "batch_tile must be a multiple of 16"
    budget = _vmem_budget_bytes()
    bt_cap = _fit_batch_tile(batch_tile, F, VF, VH, VR, in_bytes,
                             resident_bytes, budget)
    bt, n_tiles = _choose_tiling(B, bt_cap)
    Bp = bt * n_tiles
    xp = x if Bp == B else jnp.pad(x, ((0, Bp - B), (0, 0)))

    # Narrow MXU inputs (f32 accumulation happens inside the kernel).
    xc = xp.astype(mxu_dtype)
    tc = t_wide.astype(mxu_dtype)
    w1c = w_in_blk.astype(mxu_dtype)
    wmc = w_mid_blk.astype(mxu_dtype)
    woc = w_out_blk.astype(mxu_dtype)

    # Advisory scheduling hint (useful FLOPs only; zero-block MACs excluded).
    flops = 2 * Bp * (V * F * F + V * F * H + 3 * V * H * H + V * H * R)
    bytes_accessed = Bp * F * in_bytes + resident_bytes // 2 + Bp * VR * 4
    cost = pl.CostEstimate(flops=int(flops), transcendentals=0,
                           bytes_accessed=int(bytes_accessed))

    def run(single_buffer_residents):
        in_specs, out_specs = _make_specs(bt, F, VF, VH, VR, n_mid,
                                          single_buffer_residents)
        return pl.pallas_call(
            _pclad_kernel,
            out_shape=jax.ShapeDtypeStruct((Bp, VR), jnp.float32),
            grid_spec=pltpu.PrefetchScalarGridSpec(
                num_scalar_prefetch=0,
                grid=(n_tiles,),
                in_specs=in_specs,
                out_specs=out_specs,
            ),
            compiler_params=pltpu.CompilerParams(
                dimension_semantics=("parallel",),   # batch tiles -> megacore
                vmem_limit_bytes=budget,
            ),
            cost_estimate=cost,
        )(xc, tc, w1c, wmc, woc)

    try:
        out = run(single_buffer_residents=True)
    except Exception:
        # pipeline_mode=pl.Buffered(1) unsupported in this build; residents are
        # tiny at these shapes, so default double-buffering is fine.
        out = run(single_buffer_residents=False)

    # Free reshape (B, V*R) -> (B, V, R); row layout is [view0 | view1 | ...].
    return out[:B].reshape(B, V, R)


# ----------------------------------------------------------------------------
# Parameter construction & pure-JAX reference.
# ----------------------------------------------------------------------------
def build_params(key, n_features, r_type_lst, hidden=24, rep_dim=24):
    """Build: one frozen affine (w, w) network per distinct subspace width
    (same width -> same network, as in the torch dict keyed by width), the
    stacked block-diagonal transforms T_i (V, F, F), and the 5 bias-free
    encoder weight matrices."""
    widths = sorted({w for part in r_type_lst for w in part})
    keys = jax.random.split(key, len(widths) + 5)

    affine = {}
    for w, k in zip(widths, keys[: len(widths)]):
        affine[w] = np.asarray(
            jax.random.normal(k, (w, w), jnp.float32) / np.sqrt(w),
            dtype=np.float32)

    V = len(r_type_lst)
    t_stack = np.zeros((V, n_features, n_features), np.float32)
    for i, part in enumerate(r_type_lst):
        start = 0
        for w in part:
            t_stack[i, start:start + w, start:start + w] = affine[w]
            start += w

    dims = [n_features, hidden, hidden, hidden, hidden, rep_dim]
    enc_keys = keys[len(widths):]
    enc_ws = [
        (jax.random.normal(enc_keys[j], (dims[j], dims[j + 1]), jnp.float32)
         / np.sqrt(dims[j])).astype(jnp.float32)
        for j in range(5)
    ]
    return jnp.asarray(t_stack), enc_ws


def pclad_reference(x, t_stack, enc_ws, compute_dtype=None):
    """Pure-JAX per-view reference (validates the lane-fused restructure).
    If compute_dtype is given, mimic the kernel's narrow-MXU-input /
    f32-accumulation casts for apples-to-apples bf16 validation."""
    cd = compute_dtype if compute_dtype is not None else x.dtype

    def dot_f32(a, b):
        return jnp.dot(a.astype(cd), b.astype(cd),
                       preferred_element_type=jnp.float32,
                       precision=jax.lax.Precision.HIGHEST)

    V = t_stack.shape[0]
    xt = jnp.stack([dot_f32(x, t_stack[i]) for i in range(V)], axis=0)  # (V,B,F)
    h = xt
    for w in enc_ws[:-1]:
        h = jnp.maximum(dot_f32(h, w), 0.0)
    z = dot_f32(h, enc_ws[-1])                          # (V, B, R)
    return jnp.transpose(z, (1, 0, 2))                  # (B, V, R)


# ----------------------------------------------------------------------------
# Self-test.
# ----------------------------------------------------------------------------
if __name__ == "__main__":
    # Small deterministic example shapes.
    B = 8            # batch
    F = 16           # n_features
    n_trans = 3      # -> V = n_trans + 1 = 4 views
    hidden = 24
    rep_dim = 24

    # Partition pool (each row sums to F); row 0 is the identity-style view.
    r_type_lst = [
        [16],
        [8, 8],
        [4, 4, 8],
        [4, 12],
    ]
    assert len(r_type_lst) == n_trans + 1
    assert all(sum(p) == F for p in r_type_lst)

    key = jax.random.PRNGKey(0)
    k_x, k_params = jax.random.split(key)

    x = jax.random.normal(k_x, (B, F), dtype=jnp.float32)
    t_stack, enc_ws = build_params(k_params, F, r_type_lst, hidden, rep_dim)

    # 1) f32 mode: structural check of the lane-fused layout against the
    #    per-view pure-JAX reference.
    zs_f32 = jax.block_until_ready(
        pclad_encoder_forward(x, t_stack, enc_ws, mxu_dtype=jnp.float32))
    ref_f32 = jax.block_until_ready(pclad_reference(x, t_stack, enc_ws))
    np.testing.assert_allclose(np.asarray(zs_f32), np.asarray(ref_f32),
                               rtol=5e-3, atol=5e-3)

    # 2) bf16-MXU fast path (default): check against a reference with the same
    #    bf16-input / f32-accumulation casts.
    zs = jax.block_until_ready(pclad_encoder_forward(x, t_stack, enc_ws))
    ref_bf16 = jax.block_until_ready(
        pclad_reference(x, t_stack, enc_ws, compute_dtype=jnp.bfloat16))
    np.testing.assert_allclose(np.asarray(zs), np.asarray(ref_bf16),
                               rtol=1e-2, atol=1e-2)

    assert zs.shape == (B, n_trans + 1, rep_dim)
    assert zs_f32.shape == (B, n_trans + 1, rep_dim)
    print("KERNEL_OK")
</pallas_src>

<mosaic_0001>
module attributes {stable_mosaic.version = 11 : i64} {
  func.func @_pclad_kernel(%arg0: i32, %arg1: memref<16x16xf32, #tpu.memory_space<vmem>>, %arg2: memref<16x64xf32, #tpu.memory_space<vmem>>, %arg3: memref<64x96xf32, #tpu.memory_space<vmem>>, %arg4: memref<3x96x96xf32, #tpu.memory_space<vmem>>, %arg5: memref<96x96xf32, #tpu.memory_space<vmem>>, %arg6: memref<16x96xf32, #tpu.memory_space<vmem>>) attributes {dimension_semantics = [#tpu.dimension_semantics<parallel>], iteration_bounds = array<i64: 1>, scalar_prefetch = 0 : i64, scratch_operands = 0 : i64, tpu.core_type = #tpu.core_type<tc>, window_params = [{transform_indices = @transform_0, window_bounds = array<i64: 16, 16>}, {pipeline_mode = #tpu.pipeline_mode<synchronous>, transform_indices = @transform_1, window_bounds = array<i64: 16, 64>}, {pipeline_mode = #tpu.pipeline_mode<synchronous>, transform_indices = @transform_2, window_bounds = array<i64: 64, 96>}, {pipeline_mode = #tpu.pipeline_mode<synchronous>, transform_indices = @transform_3, window_bounds = array<i64: 3, 96, 96>}, {pipeline_mode = #tpu.pipeline_mode<synchronous>, transform_indices = @transform_4, window_bounds = array<i64: 96, 96>}, {transform_indices = @transform_5, window_bounds = array<i64: 16, 96>}]} {
    %c0 = arith.constant 0 : index
    %c0_0 = arith.constant 0 : index
    %0 = vector.load %arg1[%c0, %c0_0] : memref<16x16xf32, #tpu.memory_space<vmem>>, vector<16x16xf32>
    %c0_1 = arith.constant 0 : index
    %c0_2 = arith.constant 0 : index
    %1 = vector.load %arg2[%c0_1, %c0_2] : memref<16x64xf32, #tpu.memory_space<vmem>>, vector<16x64xf32>
    %cst = arith.constant dense<0.000000e+00> : vector<16x64xf32>
    %2 = tpu.matmul %0, %1, %cst {dimension_numbers = #tpu.dot_dimension_numbers<[1], [0], [0], [1], [0, 0, 1, 1], [], []>} : vector<16x16xf32>, vector<16x64xf32>, vector<16x64xf32> -> vector<16x64xf32>
    %c0_3 = arith.constant 0 : index
    %c0_4 = arith.constant 0 : index
    %3 = vector.load %arg3[%c0_3, %c0_4] : memref<64x96xf32, #tpu.memory_space<vmem>>, vector<64x96xf32>
    %cst_5 = arith.constant dense<0.000000e+00> : vector<16x96xf32>
    %4 = tpu.matmul %2, %3, %cst_5 {dimension_numbers = #tpu.dot_dimension_numbers<[1], [0], [0], [1], [0, 0, 1, 1], [], []>} : vector<16x64xf32>, vector<64x96xf32>, vector<16x96xf32> -> vector<16x96xf32>
    %cst_6 = arith.constant 0.000000e+00 : f32
    %5 = vector.broadcast %cst_6 : f32 to vector<16x96xf32>
    %6 = arith.maximumf %4, %5 : vector<16x96xf32>
    %c0_7 = arith.constant 0 : index
    %c0_8 = arith.constant 0 : index
    %c0_9 = arith.constant 0 : index
    %7 = vector.load %arg4[%c0_7, %c0_8, %c0_9] : memref<3x96x96xf32, #tpu.memory_space<vmem>>, vector<1x96x96xf32>
    %8 = vector.shape_cast %7 : vector<1x96x96xf32> to vector<96x96xf32>
    %cst_10 = arith.constant dense<0.000000e+00> : vector<16x96xf32>
    %9 = tpu.matmul %6, %8, %cst_10 {dimension_numbers = #tpu.dot_dimension_numbers<[1], [0], [0], [1], [0, 0, 1, 1], [], []>} : vector<16x96xf32>, vector<96x96xf32>, vector<16x96xf32> -> vector<16x96xf32>
    %cst_11 = arith.constant 0.000000e+00 : f32
    %10 = vector.broadcast %cst_11 : f32 to vector<16x96xf32>
    %11 = arith.maximumf %9, %10 : vector<16x96xf32>
    %c1 = arith.constant 1 : index
    %c0_12 = arith.constant 0 : index
    %c0_13 = arith.constant 0 : index
    %12 = vector.load %arg4[%c1, %c0_12, %c0_13] : memref<3x96x96xf32, #tpu.memory_space<vmem>>, vector<1x96x96xf32>
    %13 = vector.shape_cast %12 : vector<1x96x96xf32> to vector<96x96xf32>
    %cst_14 = arith.constant dense<0.000000e+00> : vector<16x96xf32>
    %14 = tpu.matmul %11, %13, %cst_14 {dimension_numbers = #tpu.dot_dimension_numbers<[1], [0], [0], [1], [0, 0, 1, 1], [], []>} : vector<16x96xf32>, vector<96x96xf32>, vector<16x96xf32> -> vector<16x96xf32>
    %cst_15 = arith.constant 0.000000e+00 : f32
    %15 = vector.broadcast %cst_15 : f32 to vector<16x96xf32>
    %16 = arith.maximumf %14, %15 : vector<16x96xf32>
    %c2 = arith.constant 2 : index
    %c0_16 = arith.constant 0 : index
    %c0_17 = arith.constant 0 : index
    %17 = vector.load %arg4[%c2, %c0_16, %c0_17] : memref<3x96x96xf32, #tpu.memory_space<vmem>>, vector<1x96x96xf32>
    %18 = vector.shape_cast %17 : vector<1x96x96xf32> to vector<96x96xf32>
    %cst_18 = arith.constant dense<0.000000e+00> : vector<16x96xf32>
    %19 = tpu.matmul %16, %18, %cst_18 {dimension_numbers = #tpu.dot_dimension_numbers<[1], [0], [0], [1], [0, 0, 1, 1], [], []>} : vector<16x96xf32>, vector<96x96xf32>, vector<16x96xf32> -> vector<16x96xf32>
    %cst_19 = arith.constant 0.000000e+00 : f32
    %20 = vector.broadcast %cst_19 : f32 to vector<16x96xf32>
    %21 = arith.maximumf %19, %20 : vector<16x96xf32>
    %c0_20 = arith.constant 0 : index
    %c0_21 = arith.constant 0 : index
    %22 = vector.load %arg5[%c0_20, %c0_21] : memref<96x96xf32, #tpu.memory_space<vmem>>, vector<96x96xf32>
    %cst_22 = arith.constant dense<0.000000e+00> : vector<16x96xf32>
    %23 = tpu.matmul %21, %22, %cst_22 {dimension_numbers = #tpu.dot_dimension_numbers<[1], [0], [0], [1], [0, 0, 1, 1], [], []>} : vector<16x96xf32>, vector<96x96xf32>, vector<16x96xf32> -> vector<16x96xf32>
    %c0_23 = arith.constant 0 : index
    %c0_24 = arith.constant 0 : index
    %24 = vector.load %arg6[%c0_23, %c0_24] : memref<16x96xf32, #tpu.memory_space<vmem>>, vector<16x96xf32>
    tpu.vector_store %arg6[%c0_23, %c0_24], %23 {strides = array<i32>} : memref<16x96xf32, #tpu.memory_space<vmem>>, vector<16x96xf32>,
    return
  }
  func.func @transform_0(%arg0: i32) -> (i32, i32) {
    %c0_i32 = arith.constant 0 : i32
    %c0_i32_0 = arith.constant 0 : i32
    return %arg0, %c0_i32 : i32, i32
  }
  func.func @transform_1(%arg0: i32) -> (i32, i32) {
    %c0_i32 = arith.constant 0 : i32
    %c0_i32_0 = arith.constant 0 : i32
    %c0_i32_1 = arith.constant 0 : i32
    return %c0_i32, %c0_i32_0 : i32, i32
  }
  func.func @transform_2(%arg0: i32) -> (i32, i32) {
    %c0_i32 = arith.constant 0 : i32
    %c0_i32_0 = arith.constant 0 : i32
    %c0_i32_1 = arith.constant 0 : i32
    return %c0_i32, %c0_i32_0 : i32, i32
  }
  func.func @transform_3(%arg0: i32) -> (i32, i32, i32) {
    %c0_i32 = arith.constant 0 : i32
    %c0_i32_0 = arith.constant 0 : i32
    %c0_i32_1 = arith.constant 0 : i32
    %c0_i32_2 = arith.constant 0 : i32
    return %c0_i32, %c0_i32_0, %c0_i32_1 : i32, i32, i32
  }
  func.func @transform_4(%arg0: i32) -> (i32, i32) {
    %c0_i32 = arith.constant 0 : i32
    %c0_i32_0 = arith.constant 0 : i32
    %c0_i32_1 = arith.constant 0 : i32
    return %c0_i32, %c0_i32_0 : i32, i32
  }
  func.func @transform_5(%arg0: i32) -> (i32, i32) {
    %c0_i32 = arith.constant 0 : i32
    %c0_i32_0 = arith.constant 0 : i32
    return %arg0, %c0_i32 : i32, i32
  }
}

module attributes {stable_mosaic.version = 11 : i64} {
  func.func @_pclad_kernel(%arg0: i32, %arg1: memref<16x16xf32, #tpu.memory_space<vmem>>, %arg2: memref<16x64xf32, #tpu.memory_space<vmem>>, %arg3: memref<64x96xf32, #tpu.memory_space<vmem>>, %arg4: memref<3x96x96xf32, #tpu.memory_space<vmem>>, %arg5: memref<96x96xf32, #tpu.memory_space<vmem>>, %arg6: memref<16x96xf32, #tpu.memory_space<vmem>>) attributes {dimension_semantics = [#tpu.dimension_semantics<parallel>], iteration_bounds = array<i64: 1>, scalar_prefetch = 0 : i64, scratch_operands = 0 : i64, tpu.core_type = #tpu.core_type<tc>, window_params = [{transform_indices = @transform_0, window_bounds = array<i64: 16, 16>}, {pipeline_mode = #tpu.pipeline_mode<synchronous>, transform_indices = @transform_1, window_bounds = array<i64: 16, 64>}, {pipeline_mode = #tpu.pipeline_mode<synchronous>, transform_indices = @transform_2, window_bounds = array<i64: 64, 96>}, {pipeline_mode = #tpu.pipeline_mode<synchronous>, transform_indices = @transform_3, window_bounds = array<i64: 3, 96, 96>}, {pipeline_mode = #tpu.pipeline_mode<synchronous>, transform_indices = @transform_4, window_bounds = array<i64: 96, 96>}, {transform_indices = @transform_5, window_bounds = array<i64: 16, 96>}]} {
    %c0 = arith.constant 0 : index
    %c0_0 = arith.constant 0 : index
    %0 = vector.load %arg1[%c0, %c0_0] : memref<16x16xf32, #tpu.memory_space<vmem>>, vector<16x16xf32>
    %c0_1 = arith.constant 0 : index
    %c0_2 = arith.constant 0 : index
    %1 = vector.load %arg2[%c0_1, %c0_2] : memref<16x64xf32, #tpu.memory_space<vmem>>, vector<16x64xf32>
    %cst = arith.constant dense<0.000000e+00> : vector<16x64xf32>
    %2 = tpu.matmul %0, %1, %cst {dimension_numbers = #tpu.dot_dimension_numbers<[1], [0], [0], [1], [0, 0, 1, 1], [], []>} : vector<16x16xf32>, vector<16x64xf32>, vector<16x64xf32> -> vector<16x64xf32>
    %c0_3 = arith.constant 0 : index
    %c0_4 = arith.constant 0 : index
    %3 = vector.load %arg3[%c0_3, %c0_4] : memref<64x96xf32, #tpu.memory_space<vmem>>, vector<64x96xf32>
    %cst_5 = arith.constant dense<0.000000e+00> : vector<16x96xf32>
    %4 = tpu.matmul %2, %3, %cst_5 {dimension_numbers = #tpu.dot_dimension_numbers<[1], [0], [0], [1], [0, 0, 1, 1], [], []>} : vector<16x64xf32>, vector<64x96xf32>, vector<16x96xf32> -> vector<16x96xf32>
    %cst_6 = arith.constant 0.000000e+00 : f32
    %5 = vector.broadcast %cst_6 : f32 to vector<16x96xf32>
    %6 = arith.maximumf %4, %5 : vector<16x96xf32>
    %c0_7 = arith.constant 0 : index
    %c0_8 = arith.constant 0 : index
    %c0_9 = arith.constant 0 : index
    %7 = vector.load %arg4[%c0_7, %c0_8, %c0_9] : memref<3x96x96xf32, #tpu.memory_space<vmem>>, vector<1x96x96xf32>
    %8 = vector.shape_cast %7 : vector<1x96x96xf32> to vector<96x96xf32>
    %cst_10 = arith.constant dense<0.000000e+00> : vector<16x96xf32>
    %9 = tpu.matmul %6, %8, %cst_10 {dimension_numbers = #tpu.dot_dimension_numbers<[1], [0], [0], [1], [0, 0, 1, 1], [], []>} : vector<16x96xf32>, vector<96x96xf32>, vector<16x96xf32> -> vector<16x96xf32>
    %cst_11 = arith.constant 0.000000e+00 : f32
    %10 = vector.broadcast %cst_11 : f32 to vector<16x96xf32>
    %11 = arith.maximumf %9, %10 : vector<16x96xf32>
    %c1 = arith.constant 1 : index
    %c0_12 = arith.constant 0 : index
    %c0_13 = arith.constant 0 : index
    %12 = vector.load %arg4[%c1, %c0_12, %c0_13] : memref<3x96x96xf32, #tpu.memory_space<vmem>>, vector<1x96x96xf32>
    %13 = vector.shape_cast %12 : vector<1x96x96xf32> to vector<96x96xf32>
    %cst_14 = arith.constant dense<0.000000e+00> : vector<16x96xf32>
    %14 = tpu.matmul %11, %13, %cst_14 {dimension_numbers = #tpu.dot_dimension_numbers<[1], [0], [0], [1], [0, 0, 1, 1], [], []>} : vector<16x96xf32>, vector<96x96xf32>, vector<16x96xf32> -> vector<16x96xf32>
    %cst_15 = arith.constant 0.000000e+00 : f32
    %15 = vector.broadcast %cst_15 : f32 to vector<16x96xf32>
    %16 = arith.maximumf %14, %15 : vector<16x96xf32>
    %c2 = arith.constant 2 : index
    %c0_16 = arith.constant 0 : index
    %c0_17 = arith.constant 0 : index
    %17 = vector.load %arg4[%c2, %c0_16, %c0_17] : memref<3x96x96xf32, #tpu.memory_space<vmem>>, vector<1x96x96xf32>
    %18 = vector.shape_cast %17 : vector<1x96x96xf32> to vector<96x96xf32>
    %cst_18 = arith.constant dense<0.000000e+00> : vector<16x96xf32>
    %19 = tpu.matmul %16, %18, %cst_18 {dimension_numbers = #tpu.dot_dimension_numbers<[1], [0], [0], [1], [0, 0, 1, 1], [], []>} : vector<16x96xf32>, vector<96x96xf32>, vector<16x96xf32> -> vector<16x96xf32>
    %cst_19 = arith.constant 0.000000e+00 : f32
    %20 = vector.broadcast %cst_19 : f32 to vector<16x96xf32>
    %21 = arith.maximumf %19, %20 : vector<16x96xf32>
    %c0_20 = arith.constant 0 : index
    %c0_21 = arith.constant 0 : index
    %22 = vector.load %arg5[%c0_20, %c0_21] : memref<96x96xf32, #tpu.memory_space<vmem>>, vector<96x96xf32>
    %cst_22 = arith.constant dense<0.000000e+00> : vector<16x96xf32>
    %23 = tpu.matmul %21, %22, %cst_22 {dimension_numbers = #tpu.dot_dimension_numbers<[1], [0], [0], [1], [0, 0, 1, 1], [], []>} : vector<16x96xf32>, vector<96x96xf32>, vector<16x96xf32> -> vector<16x96xf32>
    %c0_23 = arith.constant 0 : index
    %c0_24 = arith.constant 0 : index
    %24 = vector.load %arg6[%c0_23, %c0_24] : memref<16x96xf32, #tpu.memory_space<vmem>>, vector<16x96xf32>
    tpu.vector_store %arg6[%c0_23, %c0_24], %23 {strides = array<i32>} : memref<16x96xf32, #tpu.memory_space<vmem>>, vector<16x96xf32>,
    return
  }
  func.func @transform_0(%arg0: i32) -> (i32, i32) {
    %c0_i32 = arith.constant 0 : i32
    %c0_i32_0 = arith.constant 0 : i32
    return %arg0, %c0_i32 : i32, i32
  }
  func.func @transform_1(%arg0: i32) -> (i32, i32) {
    %c0_i32 = arith.constant 0 : i32
    %c0_i32_0 = arith.constant 0 : i32
    %c0_i32_1 = arith.constant 0 : i32
    return %c0_i32, %c0_i32_0 : i32, i32
  }
  func.func @transform_2(%arg0: i32) -> (i32, i32) {
    %c0_i32 = arith.constant 0 : i32
    %c0_i32_0 = arith.constant 0 : i32
    %c0_i32_1 = arith.constant 0 : i32
    return %c0_i32, %c0_i32_0 : i32, i32
  }
  func.func @transform_3(%arg0: i32) -> (i32, i32, i32) {
    %c0_i32 = arith.constant 0 : i32
    %c0_i32_0 = arith.constant 0 : i32
    %c0_i32_1 = arith.constant 0 : i32
    %c0_i32_2 = arith.constant 0 : i32
    return %c0_i32, %c0_i32_0, %c0_i32_1 : i32, i32, i32
  }
  func.func @transform_4(%arg0: i32) -> (i32, i32) {
    %c0_i32 = arith.constant 0 : i32
    %c0_i32_0 = arith.constant 0 : i32
    %c0_i32_1 = arith.constant 0 : i32
    return %c0_i32, %c0_i32_0 : i32, i32
  }
  func.func @transform_5(%arg0: i32) -> (i32, i32) {
    %c0_i32 = arith.constant 0 : i32
    %c0_i32_0 = arith.constant 0 : i32
    return %arg0, %c0_i32 : i32, i32
  }
}

</mosaic_0001>

<bundles_post_ra>
// kernel: tpu_custom_call.1
= control target key start
LH: loop header
LB: loop body
LE: loop exit
PB: predicated region body
PF: predicated region fallthrough
CT: control target
= control target key end

     0   :  { %10 = vsyncpa [#allocation3], 0  ;;  %s1303_s0 = inlined_call_operand.hbm [shape: f32[16,16], index: 0, kind: input, shape index: {}]   ;;  %s1304_s1 = inlined_call_operand.hbm [shape: f32[16,64], index: 1, kind: input, shape index: {}]   ;;  %s1305_s2 = inlined_call_operand.hbm [shape: f32[64,96], index: 2, kind: input, shape index: {}]   ;;  %s1306_s3 = inlined_call_operand.hbm [shape: f32[3,96,96], index: 3, kind: input, shape index: {}]   ;;  %s1307_s4 = inlined_call_operand.hbm [shape: f32[96,96], index: 4, kind: input, shape index: {}]   ;;  %s1308_s5 = inlined_call_operand.hbm [shape: f32[16,96], index: 5, kind: output, shape index: {}]  }
   0x1   :  { %11 = vsyncpa [#allocation6], 0 }
   0x2   :  { %12 = vsyncpa [#allocation9], 0 }
   0x3   :  { %13 = vsyncpa [#allocation4], 0  ;;  %s1149_s18 = smov [#allocation5]   ;;  %s1150_s20 = smov [#allocation8]  }
   0x4   :  { %s31_s19 = sshll.u32 %s1149_s18, 4  ;;  %s55_s21 = sshll.u32 %s1150_s20, 4  ;;  %s32_s19 = int_to_ptr.vmem [resolvable:$true] %s31_s19  ;;  %s1187_s21 = int_to_ptr.vmem [resolvable:$true] %s55_s21 }
   0x5   :  { %s1009_s24 = scalar_lea.hbm %s1304_s1, 256 }
   0x6   :  { %p1010_p0 = scmp.ne.s32.totalorder %s1304_s1, %s1009_s24  ;;  %p1013_p1 = scmp.lt.u32.totalorder %s1009_s24, %s1304_s1 }
   0x8   :  { %p1015_p2 = pnand %p1013_p1, %p1010_p0 }
   0xa   :  { %1018 = shalt.err (!%p1015_p2)
}
   0xb   :  { %s1019_s29 = scalar_lea.vmem %s32_s19, 256  ;;  %p1024_p4 = scmp.lt.s32.totalorder %s32_s19, %s32_s19 }
   0xc   :  { %p1020_p3 = scmp.ne.s32.totalorder %s32_s19, %s1019_s29  ;;  %p1025_p5 = scmp.lt.s32.totalorder %s1019_s29, %s1019_s29 }
   0xe   :  { %p1026_p6 = por %p1025_p5, %p1024_p4 }
  0x10   :  { %p1027_p7 = pnand %p1026_p6, %p1020_p3 }
  0x12   :  { %1030 = shalt.err (!%p1027_p7)
}
  0x13   :  { %s1151_s30 = smov 128   ;;  %s1152_s6 = smov 8  }
  0x14   :  { %37 = dma.hbm_to_vmem [thread:$0]  %s1304_s1, 256, %s32_s19, [#allocation6], %s1151_s30, %s1151_s30, %s1152_s6  }
  0x15   :  { %s1031_s11 = scalar_lea.hbm %s1306_s3, 4608 }
  0x16   :  { %p1032_p8 = scmp.ne.s32.totalorder %s1306_s3, %s1031_s11  ;;  %p1035_p9 = scmp.lt.u32.totalorder %s1031_s11, %s1306_s3 }
  0x18   :  { %p1037_p10 = pnand %p1035_p9, %p1032_p8 }
  0x1a   :  { %1040 = shalt.err (!%p1037_p10)
}
  0x1b   :  { %s1041_s16 = scalar_lea.vmem %s1187_s21, 4608  ;;  %p1046_p12 = scmp.lt.s32.totalorder %s1187_s21, %s1187_s21 }
  0x1c   :  { %p1042_p11 = scmp.ne.s32.totalorder %s1187_s21, %s1041_s16  ;;  %p1047_p13 = scmp.lt.s32.totalorder %s1041_s16, %s1041_s16 }
  0x1e   :  { %p1048_p0 = por %p1047_p13, %p1046_p12 }
  0x20   :  { %p1049_p1 = pnand %p1048_p0, %p1042_p11 }
  0x22   :  { %1052 = shalt.err (!%p1049_p1)
}
  0x23   :  { %61 = dma.hbm_to_vmem [thread:$0]  %s1306_s3, 4608, %s1187_s21, [#allocation9], %s1151_s30, %s1151_s30, %s1152_s6  }
  0x24   :  { %s1153_s18 = smov [#allocation2]   ;;  %s1154_s20 = smov [#allocation7]  }
  0x25   :  { %s19_s19 = sshll.u32 %s1153_s18, 4  ;;  %s43_s22 = sshll.u32 %s1154_s20, 4  ;;  %s20_s19 = int_to_ptr.vmem [resolvable:$true] %s19_s19  ;;  %s1224_s22 = int_to_ptr.vmem [resolvable:$true] %s43_s22 }
  0x26   :  { %s1053_s25 = scalar_lea.hbm %s1303_s0, 256 }
  0x27   :  { %p1054_p2 = scmp.ne.s32.totalorder %s1303_s0, %s1053_s25  ;;  %p1057_p3 = scmp.lt.u32.totalorder %s1053_s25, %s1303_s0 }
  0x29   :  { %p1059_p4 = pnand %p1057_p3, %p1054_p2 }
  0x2b   :  { %1062 = shalt.err (!%p1059_p4)
}
  0x2c   :  { %s1063_s3 = scalar_lea.vmem %s20_s19, 256  ;;  %p1068_p6 = scmp.lt.s32.totalorder %s20_s19, %s20_s19 }
  0x2d   :  { %p1064_p5 = scmp.ne.s32.totalorder %s20_s19, %s1063_s3  ;;  %p1069_p7 = scmp.lt.s32.totalorder %s1063_s3, %s1063_s3 }
  0x2f   :  { %p1070_p8 = por %p1069_p7, %p1068_p6 }
  0x31   :  { %p1071_p9 = pnand %p1070_p8, %p1064_p5 }
  0x33   :  { %1074 = shalt.err (!%p1071_p9)
}
  0x34   :  { %25 = dma.hbm_to_vmem [thread:$0]  %s1303_s0, 256, %s20_s19, [#allocation3], %s1151_s30, %s1151_s30, %s1152_s6  }
  0x35   :  { %s1075_s10 = scalar_lea.hbm %s1305_s2, 1024 }
  0x36   :  { %p1076_p10 = scmp.ne.s32.totalorder %s1305_s2, %s1075_s10  ;;  %p1079_p11 = scmp.lt.u32.totalorder %s1075_s10, %s1305_s2 }
  0x38   :  { %p1081_p12 = pnand %p1079_p11, %p1076_p10 }
  0x3a   :  { %1084 = shalt.err (!%p1081_p12)
}
  0x3b   :  { %s1085_s15 = scalar_lea.vmem %s1224_s22, 1024  ;;  %p1090_p0 = scmp.lt.s32.totalorder %s1224_s22, %s1224_s22 }
  0x3c   :  { %p1086_p13 = scmp.ne.s32.totalorder %s1224_s22, %s1085_s15  ;;  %p1091_p1 = scmp.lt.s32.totalorder %s1085_s15, %s1085_s15 }
  0x3e   :  { %p1092_p2 = por %p1091_p1, %p1090_p0 }
  0x40   :  { %p1093_p3 = pnand %p1092_p2, %p1086_p13 }
  0x42   :  { %1096 = shalt.err (!%p1093_p3)
}
  0x43   :  { %49 = dma.hbm_to_vmem [thread:$0]  %s1305_s2, 1024, %s1224_s22, [#allocation6], %s1151_s30, %s1151_s30, %s1152_s6  }
  0x44   :  { %s1155_s1 = smov [#allocation10]   ;;  %s1097_s20 = scalar_lea.hbm %s1307_s4, 1536 }
  0x45   :  { %s67_s17 = sshll.u32 %s1155_s1, 4  ;;  %p1098_p4 = scmp.ne.s32.totalorder %s1307_s4, %s1097_s20  ;;  %s68_s17 = int_to_ptr.vmem [resolvable:$true] %s67_s17 }
  0x46   :  { %p1101_p5 = scmp.lt.u32.totalorder %s1097_s20, %s1307_s4 }
  0x48   :  { %p1103_p6 = pnand %p1101_p5, %p1098_p4 }
  0x4a   :  { %1106 = shalt.err (!%p1103_p6)
}
  0x4b   :  { %s1107_s27 = scalar_lea.vmem %s68_s17, 1536  ;;  %p1112_p8 = scmp.lt.s32.totalorder %s68_s17, %s68_s17 }
  0x4c   :  { %p1108_p7 = scmp.ne.s32.totalorder %s68_s17, %s1107_s27  ;;  %p1113_p9 = scmp.lt.s32.totalorder %s1107_s27, %s1107_s27 }
  0x4e   :  { %p1114_p10 = por %p1113_p9, %p1112_p8 }
  0x50   :  { %p1115_p11 = pnand %p1114_p10, %p1108_p7 }
  0x52   :  { %1118 = shalt.err (!%p1115_p11)
}
  0x53   :  { %73 = dma.hbm_to_vmem [thread:$0]  %s1307_s4, 1536, %s68_s17, [#allocation9], %s1151_s30, %s1151_s30, %s1152_s6  }
  0x54   :  { %1141 = dma.done.wait [#allocation3], 256  }
  0x55   :  { %1142 = vsyncadd [#allocation3], 4294967040 }
  0x56   :  { %1143 = dma.done.wait [#allocation6], 1280  }
  0x57   :  { %1144 = vsyncadd [#allocation6], 4294966016 }
  0x58   :  { %1145 = dma.done.wait [#allocation9], 6144  }
  0x59   :  { %1146 = vsyncadd [#allocation9], 4294961152  ;;  %vm93_vm0 = vcmask 130048   ;;  %v91_v0 = vld [vmem:[#allocation5] sm:$0xff]  ;;  %v92_v1 = vld [vmem:[#allocation5 + $0x8] sm:$0xff]  ;;  %vm183_vm1 = vcmask 523264  }
  0x5a   :  { %v89_v2 = vld [vmem:[#allocation2] sm:$0xff]  ;;  %v885_v3 = vpack.c.bf16 %v92_v1, %v91_v0  ;;  %v176_v5 = vld [vmem:[#allocation7 + $0x8] sm:$0xff]  ;;  %v177_v7 = vld [vmem:[#allocation7 + $0x10] sm:$0xff]  ;;  %vm279_vm2 = vcmask 785408   ;;  %s1156_s4 = smov [#allocation11]  }
  0x5b   :  { %755 = vmatprep.mubr.msk.f32.mxu0 %vm93_vm0, %v89_v2  ;;  %v175_v4 = vld [vmem:[#allocation7] sm:$0xff]  ;;  %v178_v8 = vld [vmem:[#allocation7 + $0x18] sm:$0xff]  ;;  %v180_v11 = vld [vmem:[#allocation7 + $0x28] sm:$0xff]  ;;  %s655_s28 = sshll.u32 %s1156_s4, 4  ;;  %s656_s28 = int_to_ptr.vmem [resolvable:$true] %s655_s28 }
  0x5c   :  { %v889_v6 = vpack.c.bf16 %v176_v5, %v175_v4  ;;  %886 = vmatprep.subr.bf16.mxu0 %v885_v3  ;;  %v893_v9 = vpack.c.bf16 %v178_v8, %v177_v7  ;;  %v179_v10 = vld [vmem:[#allocation7 + $0x20] sm:$0xff]  ;;  %v90_v12 = vld [vmem:[#allocation2 + $0x8] sm:$0xff]  ;;  %v181_v14 = vld [vmem:[#allocation7 + $0x30] sm:$0xff]  ;;  %s1119_s29 = scalar_lea.vmem %s656_s28, 256  ;;  %p1124_p13 = scmp.lt.s32.totalorder %s656_s28, %s656_s28 }
  0x5d   :  { %888 = vmatpush3.bf16.msra.mxu0 %v885_v3  ;;  %v897_v13 = vpack.c.bf16 %v180_v11, %v179_v10  ;;  %v182_v15 = vld [vmem:[#allocation7 + $0x38] sm:$0xff]  ;;  %v267_v17 = vld [vmem:[#allocation8] sm:$0xff]  ;;  %v268_v18 = vld [vmem:[#allocation8 + $0x8] sm:$0xff]  ;;  %p1120_p12 = scmp.ne.s32.totalorder %s656_s28, %s1119_s29  ;;  %p1125_p0 = scmp.lt.s32.totalorder %s1119_s29, %s1119_s29 }
  0x5e   :  { %890 = vmatprep.subr.bf16.mxu1 %v889_v6  ;;  %v901_v16 = vpack.c.bf16 %v182_v15, %v181_v14  ;;  %v269_v19 = vld [vmem:[#allocation8 + $0x10] sm:$0xff]  ;;  %v905_v20 = vpack.c.bf16 %v268_v18, %v267_v17  ;;  %v270_v21 = vld [vmem:[#allocation8 + $0x18] sm:$0xff]  ;;  %v271_v23 = vld [vmem:[#allocation8 + $0x20] sm:$0xff] }
  0x5f   :  { %892 = vmatpush3.bf16.msra.mxu1 %v889_v6  ;;  %v909_v22 = vpack.c.bf16 %v270_v21, %v269_v19  ;;  %v272_v24 = vld [vmem:[#allocation8 + $0x28] sm:$0xff]  ;;  %v273_v26 = vld [vmem:[#allocation8 + $0x30] sm:$0xff]  ;;  %v274_v27 = vld [vmem:[#allocation8 + $0x38] sm:$0xff]  ;;  %p1126_p1 = por %p1125_p0, %p1124_p13 }
  0x60   :  { %894 = vmatprep.subr.bf16.mxu1 %v893_v9  ;;  %756 = vmatmul.mubr.msk.f32.vlgmr.msra.gmra.mrb[0].mxu0 %vm93_vm0, %v90_v12  ;;  %v913_v25 = vpack.c.bf16 %v272_v24, %v271_v23  ;;  %v917_v28 = vpack.c.bf16 %v274_v27, %v273_v26  ;;  %v275_v29 = vld [vmem:[#allocation8 + $0x40] sm:$0xff]  ;;  %v276_v30 = vld [vmem:[#allocation8 + $0x48] sm:$0xff]  ;;  %v277_v34 = vld [vmem:[#allocation8 + $0x50] sm:$0xff] }
  0x61   :  { %906 = vmatprep.subr.bf16.mxu0 %v905_v20  ;;  %v921_v31 = vpack.c.bf16 %v276_v30, %v275_v29  ;;  %v278_v35 = vld [vmem:[#allocation8 + $0x58] sm:$0xff]  ;;  %v364_v37 = vld [vmem:[#allocation8 + $0x60] sm:$0xff]  ;;  %v365_v38 = vld [vmem:[#allocation8 + $0x68] sm:$0xff]  ;;  %p1127_p2 = pnand %p1126_p1, %p1120_p12 }
  0x62   :  { %908 = vmatpush3.bf16.msra.mxu0 %v905_v20  ;;  %v925_v36 = vpack.c.bf16 %v278_v35, %v277_v34  ;;  %v366_v39 = vld [vmem:[#allocation8 + $0x70] sm:$0xff]  ;;  %v929_v40 = vpack.c.bf16 %v365_v38, %v364_v37  ;;  %v367_v41 = vld [vmem:[#allocation8 + $0x78] sm:$0xff]  ;;  %v368_v43 = vld [vmem:[#allocation8 + $0x80] sm:$0xff] }
  0x63   :  { %896 = vmatpush3.bf16.msra.mxu1 %v893_v9  ;;  %910 = vmatprep.subr.bf16.mxu0 %v909_v22  ;;  %v933_v42 = vpack.c.bf16 %v367_v41, %v366_v39  ;;  %v369_v44 = vld [vmem:[#allocation8 + $0x88] sm:$0xff]  ;;  %v370_v46 = vld [vmem:[#allocation8 + $0x90] sm:$0xff]  ;;  %v371_v47 = vld [vmem:[#allocation8 + $0x98] sm:$0xff] }
  0x64   :  { %898 = vmatprep.subr.bf16.mxu1 %v897_v13  ;;  %v937_v45 = vpack.c.bf16 %v369_v44, %v368_v43  ;;  %v941_v48 = vpack.c.bf16 %v371_v47, %v370_v46  ;;  %v372_v49 = vld [vmem:[#allocation8 + $0xa0] sm:$0xff]  ;;  %v373_v50 = vld [vmem:[#allocation8 + $0xa8] sm:$0xff]  ;;  %v374_v56 = vld [vmem:[#allocation8 + $0xb0] sm:$0xff] }
  0x65   :  { %v945_v51 = vpack.c.bf16 %v373_v50, %v372_v49  ;;  %v375_v57 = vld [vmem:[#allocation8 + $0xb8] sm:$0xff]  ;;  %v460_v59 = vld [vmem:[#allocation8 + $0xc0] sm:$0xff]  ;;  %v461_v60 = vld [vmem:[#allocation8 + $0xc8] sm:$0xff] }
  0x66   :  { %912 = vmatpush3.bf16.msra.mxu0 %v909_v22  ;;  %v949_v58 = vpack.c.bf16 %v375_v57, %v374_v56  ;;  %v462_v61 = vld [vmem:[#allocation8 + $0xd0] sm:$0xff]  ;;  %v953_v62 = vpack.c.bf16 %v461_v60, %v460_v59  ;;  %v463_v63 = vld [vmem:[#allocation8 + $0xd8] sm:$0xff]  ;;  %v464_v1 = vld [vmem:[#allocation8 + $0xe0] sm:$0xff] }
  0x67   :  { %900 = vmatpush3.bf16.msra.mxu1 %v897_v13  ;;  %914 = vmatprep.subr.bf16.mxu0 %v913_v25  ;;  %v957_v0 = vpack.c.bf16 %v463_v63, %v462_v61  ;;  %v465_v2 = vld [vmem:[#allocation8 + $0xe8] sm:$0xff]  ;;  %v466_v4 = vld [vmem:[#allocation8 + $0xf0] sm:$0xff]  ;;  %v467_v5 = vld [vmem:[#allocation8 + $0xf8] sm:$0xff] }
  0x68   :  { %902 = vmatprep.subr.bf16.mxu1 %v901_v16  ;;  %v961_v3 = vpack.c.bf16 %v465_v2, %v464_v1  ;;  %v965_v6 = vpack.c.bf16 %v467_v5, %v466_v4  ;;  %v468_v7 = vld [vmem:[#allocation8 + $0x100] sm:$0xff]  ;;  %v469_v8 = vld [vmem:[#allocation8 + $0x108] sm:$0xff]  ;;  %v470_v14 = vld [vmem:[#allocation8 + $0x110] sm:$0xff] }
  0x69   :  { %v969_v9 = vpack.c.bf16 %v469_v8, %v468_v7  ;;  %v471_v15 = vld [vmem:[#allocation8 + $0x118] sm:$0xff]  ;;  %v555_v17 = vld [vmem:[#allocation10] sm:$0xff]  ;;  %v556_v18 = vld [vmem:[#allocation10 + $0x8] sm:$0xff] }
  0x6a   :  { %916 = vmatpush3.bf16.msra.mxu0 %v913_v25  ;;  %v557_v19 = vld [vmem:[#allocation10 + $0x10] sm:$0xff]  ;;  %v977_v20 = vpack.c.bf16 %v556_v18, %v555_v17  ;;  %v558_v21 = vld [vmem:[#allocation10 + $0x18] sm:$0xff]  ;;  %v559_v23 = vld [vmem:[#allocation10 + $0x20] sm:$0xff] }
  0x6b   :  { %904 = vmatpush3.bf16.msra.mxu1 %v901_v16  ;;  %918 = vmatprep.subr.bf16.mxu0 %v917_v28  ;;  %v973_v16 = vpack.c.bf16 %v471_v15, %v470_v14  ;;  %v981_v22 = vpack.c.bf16 %v558_v21, %v557_v19  ;;  %v560_v24 = vld [vmem:[#allocation10 + $0x28] sm:$0xff]  ;;  %v561_v26 = vld [vmem:[#allocation10 + $0x30] sm:$0xff]  ;;  %v562_v27 = vld [vmem:[#allocation10 + $0x38] sm:$0xff] }
  0x6c   :  { %930 = vmatprep.subr.bf16.mxu1 %v929_v40  ;;  %v985_v25 = vpack.c.bf16 %v560_v24, %v559_v23  ;;  %v563_v29 = vld [vmem:[#allocation10 + $0x40] sm:$0xff]  ;;  %v564_v30 = vld [vmem:[#allocation10 + $0x48] sm:$0xff]  ;;  %v566_v37 = vld [vmem:[#allocation10 + $0x58] sm:$0xff] }
  0x6e   :  { %920 = vmatpush3.bf16.msra.mxu0 %v917_v28  ;;  %v989_v28 = vpack.c.bf16 %v562_v27, %v561_v26 }
  0x6f   :  { %922 = vmatprep.subr.bf16.mxu0 %v921_v31 }
  0x72   :  { %924 = vmatpush3.bf16.msra.mxu0 %v921_v31  ;;  %v993_v31 = vpack.c.bf16 %v564_v30, %v563_v29 }
  0x73   :  { %926 = vmatprep.subr.bf16.mxu0 %v925_v36 }
  0x76   :  { %928 = vmatpush3.bf16.msra.mxu0 %v925_v36  ;;  %v565_v36 = vld [vmem:[#allocation10 + $0x50] sm:$0xff] }
  0x77   :  { %954 = vmatprep.subr.bf16.mxu0 %v953_v62  ;;  %v997_v38 = vpack.c.bf16 %v566_v37, %v565_v36 }
 0x133   :  { %v757_v32 = vpop.f32.mrb[0].mxu0 }
 0x134   :  { %v166_v33 = vpop.f32.mrb[1].mxu0 }
 0x135   :  { %774 = vmatprep.mubr.msk.f32.mxu1 %vm183_vm1, %v166_v33 }
 0x136   :  { %775 = vmatmul.mubr.msk.f32.vlgmr.msra.gmra.mrb[0].mxu1 %vm183_vm1, %v757_v32 }
 0x137   :  { %932 = vmatpush3.bf16.msra.mxu1 %v929_v40 }
 0x138   :  { %934 = vmatprep.subr.bf16.mxu1 %v933_v42 }
 0x13b   :  { %936 = vmatpush3.bf16.msra.mxu1 %v933_v42 }
 0x13c   :  { %938 = vmatprep.subr.bf16.mxu1 %v937_v45 }
 0x13f   :  { %940 = vmatpush3.bf16.msra.mxu1 %v937_v45 }
 0x140   :  { %942 = vmatprep.subr.bf16.mxu1 %v941_v48 }
 0x143   :  { %944 = vmatpush3.bf16.msra.mxu1 %v941_v48 }
 0x144   :  { %946 = vmatprep.subr.bf16.mxu1 %v945_v51 }
 0x147   :  { %948 = vmatpush3.bf16.msra.mxu1 %v945_v51 }
 0x148   :  { %950 = vmatprep.subr.bf16.mxu1 %v949_v58 }
 0x14b   :  { %952 = vmatpush3.bf16.msra.mxu1 %v949_v58 }
 0x14c   :  { %978 = vmatprep.subr.bf16.mxu1 %v977_v20 }
 0x209   :  { %v776_v52 = vpop.f32.mrb[0].mxu1 }
 0x20a   :  { %v256_v53 = vpop.f32.mrb[1].mxu1  ;;  %v266_v55 = vmax.f32 %v776_v52, 0.0 }
 0x20b   :  { %v265_v54 = vmax.f32 %v256_v53, 0.0 }
 0x20d   :  { %801 = vmatprep.mubr.msk.f32.mxu0 %vm279_vm2, %v265_v54 }
 0x20e   :  { %802 = vmatmul.mubr.msk.f32.vlgmr.msra.gmra.mrb[2].mxu0 %vm279_vm2, %v266_v55 }
 0x20f   :  { %956 = vmatpush3.bf16.msra.mxu0 %v953_v62 }
 0x210   :  { %958 = vmatprep.subr.bf16.mxu0 %v957_v0 }
 0x213   :  { %960 = vmatpush3.bf16.msra.mxu0 %v957_v0 }
 0x214   :  { %962 = vmatprep.subr.bf16.mxu0 %v961_v3 }
 0x217   :  { %964 = vmatpush3.bf16.msra.mxu0 %v961_v3 }
 0x218   :  { %966 = vmatprep.subr.bf16.mxu0 %v965_v6 }
 0x21b   :  { %968 = vmatpush3.bf16.msra.mxu0 %v965_v6 }
 0x21c   :  { %970 = vmatprep.subr.bf16.mxu0 %v969_v9 }
 0x21f   :  { %972 = vmatpush3.bf16.msra.mxu0 %v969_v9 }
 0x220   :  { %974 = vmatprep.subr.bf16.mxu0 %v973_v16 }
 0x223   :  { %976 = vmatpush3.bf16.msra.mxu0 %v973_v16 }
 0x2e1   :  { %v803_v10 = vpop.f32.mrb[2].mxu0 }
 0x2e2   :  { %v352_v11 = vpop.f32.mrb[3].mxu0  ;;  %v362_v13 = vmax.f32 %v803_v10, 0.0 }
 0x2e3   :  { %v361_v12 = vmax.f32 %v352_v11, 0.0 }
 0x2e5   :  { %828 = vmatprep.mubr.msk.f32.mxu1 %vm279_vm2, %v361_v12 }
 0x2e6   :  { %829 = vmatmul.mubr.msk.f32.vlgmr.msra.gmra.mrb[2].mxu1 %vm279_vm2, %v362_v13 }
 0x2e7   :  { %980 = vmatpush3.bf16.msra.mxu1 %v977_v20 }
 0x2e8   :  { %982 = vmatprep.subr.bf16.mxu1 %v981_v22 }
 0x2eb   :  { %984 = vmatpush3.bf16.msra.mxu1 %v981_v22 }
 0x2ec   :  { %986 = vmatprep.subr.bf16.mxu1 %v985_v25 }
 0x2ef   :  { %988 = vmatpush3.bf16.msra.mxu1 %v985_v25 }
 0x2f0   :  { %990 = vmatprep.subr.bf16.mxu1 %v989_v28 }
 0x2f3   :  { %992 = vmatpush3.bf16.msra.mxu1 %v989_v28 }
 0x2f4   :  { %994 = vmatprep.subr.bf16.mxu1 %v993_v31 }
 0x2f7   :  { %996 = vmatpush3.bf16.msra.mxu1 %v993_v31 }
 0x2f8   :  { %998 = vmatprep.subr.bf16.mxu1 %v997_v38 }
 0x2fb   :  { %1000 = vmatpush3.bf16.msra.mxu1 %v997_v38 }
 0x3b9   :  { %v830_v32 = vpop.f32.mrb[2].mxu1 }
 0x3ba   :  { %v448_v33 = vpop.f32.mrb[3].mxu1  ;;  %v458_v35 = vmax.f32 %v830_v32, 0.0 }
 0x3bb   :  { %v457_v34 = vmax.f32 %v448_v33, 0.0 }
 0x3bd   :  { %855 = vmatprep.mubr.msk.f32.mxu0 %vm279_vm2, %v457_v34 }
 0x3be   :  { %856 = vmatmul.mubr.msk.f32.vlgmr.msra.gmra.mrb[4].mxu0 %vm279_vm2, %v458_v35 }
 0x491   :  { %v857_v39 = vpop.f32.mrb[4].mxu0 }
 0x492   :  { %v544_v40 = vpop.f32.mrb[5].mxu0  ;;  %v554_v42 = vmax.f32 %v857_v39, 0.0 }
 0x493   :  { %v553_v41 = vmax.f32 %v544_v40, 0.0 }
 0x495   :  { %882 = vmatprep.mubr.msk.f32.mxu1 %vm279_vm2, %v553_v41 }
 0x496   :  { %883 = vmatmul.mubr.msk.f32.vlgmr.msra.gmra.mrb[4].mxu1 %vm279_vm2, %v554_v42 }
 0x569   :  { %v884_v43 = vpop.f32.mrb[4].mxu1 }
 0x56a   :  { %649 = vst.msk [vmem:[#allocation11 + $0x8] sm:$0xff] %vm279_vm2, %v884_v43  ;;  %v639_v44 = vpop.f32.mrb[5].mxu1 }
 0x56b   :  { %648 = vst.msk [vmem:[#allocation11] sm:$0xff] %vm279_vm2, %v639_v44 }
 0x56c   :  { %1130 = shalt.err (!%p1127_p2)
}
 0x56d   :  { %s1131_s7 = scalar_lea.hbm %s1308_s5, 256 }
 0x56e   :  { %p1132_p3 = scmp.ne.s32.totalorder %s1308_s5, %s1131_s7  ;;  %p1135_p4 = scmp.lt.u32.totalorder %s1131_s7, %s1308_s5 }
 0x570   :  { %p1137_p5 = pnand %p1135_p4, %p1132_p3 }
 0x572   :  { %1140 = shalt.err (!%p1137_p5)
}
 0x573   :  { %661 = dma.vmem_to_hbm [thread:$0]  %s656_s28, 256, %s1308_s5, [#allocation4], %s1151_s30, %s1151_s30, %s1152_s6  }
 0x574   :  { %1147 = dma.done.wait [#allocation4], 256  }
 0x575   :  { %1148 = vsyncadd [#allocation4], 4294967040 }
 0x576   :  { %665 = vsyncpa [#allocation3], 1 }
 0x577   :  { %666 = vsyncpa [#allocation6], 1 }
 0x578   :  { %667 = vsyncpa [#allocation9], 1 }
 0x579   :  { %668 = vsyncpa [#allocation4], 1 }

// kernel: tpu_custom_call.1
= control target key start
LH: loop header
LB: loop body
LE: loop exit
PB: predicated region body
PF: predicated region fallthrough
CT: control target
= control target key end

     0   :  { %10 = vsyncpa [#allocation3], 0  ;;  %s1303_s0 = inlined_call_operand.hbm [shape: f32[16,16], index: 0, kind: input, shape index: {}]   ;;  %s1304_s1 = inlined_call_operand.hbm [shape: f32[16,64], index: 1, kind: input, shape index: {}]   ;;  %s1305_s2 = inlined_call_operand.hbm [shape: f32[64,96], index: 2, kind: input, shape index: {}]   ;;  %s1306_s3 = inlined_call_operand.hbm [shape: f32[3,96,96], index: 3, kind: input, shape index: {}]   ;;  %s1307_s4 = inlined_call_operand.hbm [shape: f32[96,96], index: 4, kind: input, shape index: {}]   ;;  %s1308_s5 = inlined_call_operand.hbm [shape: f32[16,96], index: 5, kind: output, shape index: {}]  }
   0x1   :  { %11 = vsyncpa [#allocation6], 0 }
   0x2   :  { %12 = vsyncpa [#allocation9], 0 }
   0x3   :  { %13 = vsyncpa [#allocation4], 0  ;;  %s1149_s18 = smov [#allocation5]   ;;  %s1150_s20 = smov [#allocation8]  }
   0x4   :  { %s31_s19 = sshll.u32 %s1149_s18, 4  ;;  %s55_s21 = sshll.u32 %s1150_s20, 4  ;;  %s32_s19 = int_to_ptr.vmem [resolvable:$true] %s31_s19  ;;  %s1187_s21 = int_to_ptr.vmem [resolvable:$true] %s55_s21 }
   0x5   :  { %s1009_s24 = scalar_lea.hbm %s1304_s1, 256 }
   0x6   :  { %p1010_p0 = scmp.ne.s32.totalorder %s1304_s1, %s1009_s24  ;;  %p1013_p1 = scmp.lt.u32.totalorder %s1009_s24, %s1304_s1 }
   0x8   :  { %p1015_p2 = pnand %p1013_p1, %p1010_p0 }
   0xa   :  { %1018 = shalt.err (!%p1015_p2)
}
   0xb   :  { %s1019_s29 = scalar_lea.vmem %s32_s19, 256  ;;  %p1024_p4 = scmp.lt.s32.totalorder %s32_s19, %s32_s19 }
   0xc   :  { %p1020_p3 = scmp.ne.s32.totalorder %s32_s19, %s1019_s29  ;;  %p1025_p5 = scmp.lt.s32.totalorder %s1019_s29, %s1019_s29 }
   0xe   :  { %p1026_p6 = por %p1025_p5, %p1024_p4 }
  0x10   :  { %p1027_p7 = pnand %p1026_p6, %p1020_p3 }
  0x12   :  { %1030 = shalt.err (!%p1027_p7)
}
  0x13   :  { %s1151_s30 = smov 128   ;;  %s1152_s6 = smov 8  }
  0x14   :  { %37 = dma.hbm_to_vmem [thread:$0]  %s1304_s1, 256, %s32_s19, [#allocation6], %s1151_s30, %s1151_s30, %s1152_s6  }
  0x15   :  { %s1031_s11 = scalar_lea.hbm %s1306_s3, 4608 }
  0x16   :  { %p1032_p8 = scmp.ne.s32.totalorder %s1306_s3, %s1031_s11  ;;  %p1035_p9 = scmp.lt.u32.totalorder %s1031_s11, %s1306_s3 }
  0x18   :  { %p1037_p10 = pnand %p1035_p9, %p1032_p8 }
  0x1a   :  { %1040 = shalt.err (!%p1037_p10)
}
  0x1b   :  { %s1041_s16 = scalar_lea.vmem %s1187_s21, 4608  ;;  %p1046_p12 = scmp.lt.s32.totalorder %s1187_s21, %s1187_s21 }
  0x1c   :  { %p1042_p11 = scmp.ne.s32.totalorder %s1187_s21, %s1041_s16  ;;  %p1047_p13 = scmp.lt.s32.totalorder %s1041_s16, %s1041_s16 }
  0x1e   :  { %p1048_p0 = por %p1047_p13, %p1046_p12 }
  0x20   :  { %p1049_p1 = pnand %p1048_p0, %p1042_p11 }
  0x22   :  { %1052 = shalt.err (!%p1049_p1)
}
  0x23   :  { %61 = dma.hbm_to_vmem [thread:$0]  %s1306_s3, 4608, %s1187_s21, [#allocation9], %s1151_s30, %s1151_s30, %s1152_s6  }
  0x24   :  { %s1153_s18 = smov [#allocation2]   ;;  %s1154_s20 = smov [#allocation7]  }
  0x25   :  { %s19_s19 = sshll.u32 %s1153_s18, 4  ;;  %s43_s22 = sshll.u32 %s1154_s20, 4  ;;  %s20_s19 = int_to_ptr.vmem [resolvable:$true] %s19_s19  ;;  %s1224_s22 = int_to_ptr.vmem [resolvable:$true] %s43_s22 }
  0x26   :  { %s1053_s25 = scalar_lea.hbm %s1303_s0, 256 }
  0x27   :  { %p1054_p2 = scmp.ne.s32.totalorder %s1303_s0, %s1053_s25  ;;  %p1057_p3 = scmp.lt.u32.totalorder %s1053_s25, %s1303_s0 }
  0x29   :  { %p1059_p4 = pnand %p1057_p3, %p1054_p2 }
  0x2b   :  { %1062 = shalt.err (!%p1059_p4)
}
  0x2c   :  { %s1063_s3 = scalar_lea.vmem %s20_s19, 256  ;;  %p1068_p6 = scmp.lt.s32.totalorder %s20_s19, %s20_s19 }
  0x2d   :  { %p1064_p5 = scmp.ne.s32.totalorder %s20_s19, %s1063_s3  ;;  %p1069_p7 = scmp.lt.s32.totalorder %s1063_s3, %s1063_s3 }
  0x2f   :  { %p1070_p8 = por %p1069_p7, %p1068_p6 }
  0x31   :  { %p1071_p9 = pnand %p1070_p8, %p1064_p5 }
  0x33   :  { %1074 = shalt.err (!%p1071_p9)
}
  0x34   :  { %25 = dma.hbm_to_vmem [thread:$0]  %s1303_s0, 256, %s20_s19, [#allocation3], %s1151_s30, %s1151_s30, %s1152_s6  }
  0x35   :  { %s1075_s10 = scalar_lea.hbm %s1305_s2, 1024 }
  0x36   :  { %p1076_p10 = scmp.ne.s32.totalorder %s1305_s2, %s1075_s10  ;;  %p1079_p11 = scmp.lt.u32.totalorder %s1075_s10, %s1305_s2 }
  0x38   :  { %p1081_p12 = pnand %p1079_p11, %p1076_p10 }
  0x3a   :  { %1084 = shalt.err (!%p1081_p12)
}
  0x3b   :  { %s1085_s15 = scalar_lea.vmem %s1224_s22, 1024  ;;  %p1090_p0 = scmp.lt.s32.totalorder %s1224_s22, %s1224_s22 }
  0x3c   :  { %p1086_p13 = scmp.ne.s32.totalorder %s1224_s22, %s1085_s15  ;;  %p1091_p1 = scmp.lt.s32.totalorder %s1085_s15, %s1085_s15 }
  0x3e   :  { %p1092_p2 = por %p1091_p1, %p1090_p0 }
  0x40   :  { %p1093_p3 = pnand %p1092_p2, %p1086_p13 }
  0x42   :  { %1096 = shalt.err (!%p1093_p3)
}
  0x43   :  { %49 = dma.hbm_to_vmem [thread:$0]  %s1305_s2, 1024, %s1224_s22, [#allocation6], %s1151_s30, %s1151_s30, %s1152_s6  }
  0x44   :  { %s1155_s1 = smov [#allocation10]   ;;  %s1097_s20 = scalar_lea.hbm %s1307_s4, 1536 }
  0x45   :  { %s67_s17 = sshll.u32 %s1155_s1, 4  ;;  %p1098_p4 = scmp.ne.s32.totalorder %s1307_s4, %s1097_s20  ;;  %s68_s17 = int_to_ptr.vmem [resolvable:$true] %s67_s17 }
  0x46   :  { %p1101_p5 = scmp.lt.u32.totalorder %s1097_s20, %s1307_s4 }
  0x48   :  { %p1103_p6 = pnand %p1101_p5, %p1098_p4 }
  0x4a   :  { %1106 = shalt.err (!%p1103_p6)
}
  0x4b   :  { %s1107_s27 = scalar_lea.vmem %s68_s17, 1536  ;;  %p1112_p8 = scmp.lt.s32.totalorder %s68_s17, %s68_s17 }
  0x4c   :  { %p1108_p7 = scmp.ne.s32.totalorder %s68_s17, %s1107_s27  ;;  %p1113_p9 = scmp.lt.s32.totalorder %s1107_s27, %s1107_s27 }
  0x4e   :  { %p1114_p10 = por %p1113_p9, %p1112_p8 }
  0x50   :  { %p1115_p11 = pnand %p1114_p10, %p1108_p7 }
  0x52   :  { %1118 = shalt.err (!%p1115_p11)
}
  0x53   :  { %73 = dma.hbm_to_vmem [thread:$0]  %s1307_s4, 1536, %s68_s17, [#allocation9], %s1151_s30, %s1151_s30, %s1152_s6  }
  0x54   :  { %1141 = dma.done.wait [#allocation3], 256  }
  0x55   :  { %1142 = vsyncadd [#allocation3], 4294967040 }
  0x56   :  { %1143 = dma.done.wait [#allocation6], 1280  }
  0x57   :  { %1144 = vsyncadd [#allocation6], 4294966016 }
  0x58   :  { %1145 = dma.done.wait [#allocation9], 6144  }
  0x59   :  { %1146 = vsyncadd [#allocation9], 4294961152  ;;  %vm93_vm0 = vcmask 130048   ;;  %v91_v0 = vld [vmem:[#allocation5] sm:$0xff]  ;;  %v92_v1 = vld [vmem:[#allocation5 + $0x8] sm:$0xff]  ;;  %vm183_vm1 = vcmask 523264  }
  0x5a   :  { %v89_v2 = vld [vmem:[#allocation2] sm:$0xff]  ;;  %v885_v3 = vpack.c.bf16 %v92_v1, %v91_v0  ;;  %v176_v5 = vld [vmem:[#allocation7 + $0x8] sm:$0xff]  ;;  %v177_v7 = vld [vmem:[#allocation7 + $0x10] sm:$0xff]  ;;  %vm279_vm2 = vcmask 785408   ;;  %s1156_s4 = smov [#allocation11]  }
  0x5b   :  { %755 = vmatprep.mubr.msk.f32.mxu0 %vm93_vm0, %v89_v2  ;;  %v175_v4 = vld [vmem:[#allocation7] sm:$0xff]  ;;  %v178_v8 = vld [vmem:[#allocation7 + $0x18] sm:$0xff]  ;;  %v180_v11 = vld [vmem:[#allocation7 + $0x28] sm:$0xff]  ;;  %s655_s28 = sshll.u32 %s1156_s4, 4  ;;  %s656_s28 = int_to_ptr.vmem [resolvable:$true] %s655_s28 }
  0x5c   :  { %v889_v6 = vpack.c.bf16 %v176_v5, %v175_v4  ;;  %886 = vmatprep.subr.bf16.mxu0 %v885_v3  ;;  %v893_v9 = vpack.c.bf16 %v178_v8, %v177_v7  ;;  %v179_v10 = vld [vmem:[#allocation7 + $0x20] sm:$0xff]  ;;  %v90_v12 = vld [vmem:[#allocation2 + $0x8] sm:$0xff]  ;;  %v181_v14 = vld [vmem:[#allocation7 + $0x30] sm:$0xff]  ;;  %s1119_s29 = scalar_lea.vmem %s656_s28, 256  ;;  %p1124_p13 = scmp.lt.s32.totalorder %s656_s28, %s656_s28 }
  0x5d   :  { %888 = vmatpush3.bf16.msra.mxu0 %v885_v3  ;;  %v897_v13 = vpack.c.bf16 %v180_v11, %v179_v10  ;;  %v182_v15 = vld [vmem:[#allocation7 + $0x38] sm:$0xff]  ;;  %v267_v17 = vld [vmem:[#allocation8] sm:$0xff]  ;;  %v268_v18 = vld [vmem:[#allocation8 + $0x8] sm:$0xff]  ;;  %p1120_p12 = scmp.ne.s32.totalorder %s656_s28, %s1119_s29  ;;  %p1125_p0 = scmp.lt.s32.totalorder %s1119_s29, %s1119_s29 }
  0x5e   :  { %890 = vmatprep.subr.bf16.mxu1 %v889_v6  ;;  %v901_v16 = vpack.c.bf16 %v182_v15, %v181_v14  ;;  %v269_v19 = vld [vmem:[#allocation8 + $0x10] sm:$0xff]  ;;  %v905_v20 = vpack.c.bf16 %v268_v18, %v267_v17  ;;  %v270_v21 = vld [vmem:[#allocation8 + $0x18] sm:$0xff]  ;;  %v271_v23 = vld [vmem:[#allocation8 + $0x20] sm:$0xff] }
  0x5f   :  { %892 = vmatpush3.bf16.msra.mxu1 %v889_v6  ;;  %v909_v22 = vpack.c.bf16 %v270_v21, %v269_v19  ;;  %v272_v24 = vld [vmem:[#allocation8 + $0x28] sm:$0xff]  ;;  %v273_v26 = vld [vmem:[#allocation8 + $0x30] sm:$0xff]  ;;  %v274_v27 = vld [vmem:[#allocation8 + $0x38] sm:$0xff]  ;;  %p1126_p1 = por %p1125_p0, %p1124_p13 }
  0x60   :  { %894 = vmatprep.subr.bf16.mxu1 %v893_v9  ;;  %756 = vmatmul.mubr.msk.f32.vlgmr.msra.gmra.mrb[0].mxu0 %vm93_vm0, %v90_v12  ;;  %v913_v25 = vpack.c.bf16 %v272_v24, %v271_v23  ;;  %v917_v28 = vpack.c.bf16 %v274_v27, %v273_v26  ;;  %v275_v29 = vld [vmem:[#allocation8 + $0x40] sm:$0xff]  ;;  %v276_v30 = vld [vmem:[#allocation8 + $0x48] sm:$0xff]  ;;  %v277_v34 = vld [vmem:[#allocation8 + $0x50] sm:$0xff] }
  0x61   :  { %906 = vmatprep.subr.bf16.mxu0 %v905_v20  ;;  %v921_v31 = vpack.c.bf16 %v276_v30, %v275_v29  ;;  %v278_v35 = vld [vmem:[#allocation8 + $0x58] sm:$0xff]  ;;  %v364_v37 = vld [vmem:[#allocation8 + $0x60] sm:$0xff]  ;;  %v365_v38 = vld [vmem:[#allocation8 + $0x68] sm:$0xff]  ;;  %p1127_p2 = pnand %p1126_p1, %p1120_p12 }
  0x62   :  { %908 = vmatpush3.bf16.msra.mxu0 %v905_v20  ;;  %v925_v36 = vpack.c.bf16 %v278_v35, %v277_v34  ;;  %v366_v39 = vld [vmem:[#allocation8 + $0x70] sm:$0xff]  ;;  %v929_v40 = vpack.c.bf16 %v365_v38, %v364_v37  ;;  %v367_v41 = vld [vmem:[#allocation8 + $0x78] sm:$0xff]  ;;  %v368_v43 = vld [vmem:[#allocation8 + $0x80] sm:$0xff] }
  0x63   :  { %896 = vmatpush3.bf16.msra.mxu1 %v893_v9  ;;  %910 = vmatprep.subr.bf16.mxu0 %v909_v22  ;;  %v933_v42 = vpack.c.bf16 %v367_v41, %v366_v39  ;;  %v369_v44 = vld [vmem:[#allocation8 + $0x88] sm:$0xff]  ;;  %v370_v46 = vld [vmem:[#allocation8 + $0x90] sm:$0xff]  ;;  %v371_v47 = vld [vmem:[#allocation8 + $0x98] sm:$0xff] }
  0x64   :  { %898 = vmatprep.subr.bf16.mxu1 %v897_v13  ;;  %v937_v45 = vpack.c.bf16 %v369_v44, %v368_v43  ;;  %v941_v48 = vpack.c.bf16 %v371_v47, %v370_v46  ;;  %v372_v49 = vld [vmem:[#allocation8 + $0xa0] sm:$0xff]  ;;  %v373_v50 = vld [vmem:[#allocation8 + $0xa8] sm:$0xff]  ;;  %v374_v56 = vld [vmem:[#allocation8 + $0xb0] sm:$0xff] }
  0x65   :  { %v945_v51 = vpack.c.bf16 %v373_v50, %v372_v49  ;;  %v375_v57 = vld [vmem:[#allocation8 + $0xb8] sm:$0xff]  ;;  %v460_v59 = vld [vmem:[#allocation8 + $0xc0] sm:$0xff]  ;;  %v461_v60 = vld [vmem:[#allocation8 + $0xc8] sm:$0xff] }
  0x66   :  { %912 = vmatpush3.bf16.msra.mxu0 %v909_v22  ;;  %v949_v58 = vpack.c.bf16 %v375_v57, %v374_v56  ;;  %v462_v61 = vld [vmem:[#allocation8 + $0xd0] sm:$0xff]  ;;  %v953_v62 = vpack.c.bf16 %v461_v60, %v460_v59  ;;  %v463_v63 = vld [vmem:[#allocation8 + $0xd8] sm:$0xff]  ;;  %v464_v1 = vld [vmem:[#allocation8 + $0xe0] sm:$0xff] }
  0x67   :  { %900 = vmatpush3.bf16.msra.mxu1 %v897_v13  ;;  %914 = vmatprep.subr.bf16.mxu0 %v913_v25  ;;  %v957_v0 = vpack.c.bf16 %v463_v63, %v462_v61  ;;  %v465_v2 = vld [vmem:[#allocation8 + $0xe8] sm:$0xff]  ;;  %v466_v4 = vld [vmem:[#allocation8 + $0xf0] sm:$0xff]  ;;  %v467_v5 = vld [vmem:[#allocation8 + $0xf8] sm:$0xff] }
  0x68   :  { %902 = vmatprep.subr.bf16.mxu1 %v901_v16  ;;  %v961_v3 = vpack.c.bf16 %v465_v2, %v464_v1  ;;  %v965_v6 = vpack.c.bf16 %v467_v5, %v466_v4  ;;  %v468_v7 = vld [vmem:[#allocation8 + $0x100] sm:$0xff]  ;;  %v469_v8 = vld [vmem:[#allocation8 + $0x108] sm:$0xff]  ;;  %v470_v14 = vld [vmem:[#allocation8 + $0x110] sm:$0xff] }
  0x69   :  { %v969_v9 = vpack.c.bf16 %v469_v8, %v468_v7  ;;  %v471_v15 = vld [vmem:[#allocation8 + $0x118] sm:$0xff]  ;;  %v555_v17 = vld [vmem:[#allocation10] sm:$0xff]  ;;  %v556_v18 = vld [vmem:[#allocation10 + $0x8] sm:$0xff] }
  0x6a   :  { %916 = vmatpush3.bf16.msra.mxu0 %v913_v25  ;;  %v557_v19 = vld [vmem:[#allocation10 + $0x10] sm:$0xff]  ;;  %v977_v20 = vpack.c.bf16 %v556_v18, %v555_v17  ;;  %v558_v21 = vld [vmem:[#allocation10 + $0x18] sm:$0xff]  ;;  %v559_v23 = vld [vmem:[#allocation10 + $0x20] sm:$0xff] }
  0x6b   :  { %904 = vmatpush3.bf16.msra.mxu1 %v901_v16  ;;  %918 = vmatprep.subr.bf16.mxu0 %v917_v28  ;;  %v973_v16 = vpack.c.bf16 %v471_v15, %v470_v14  ;;  %v981_v22 = vpack.c.bf16 %v558_v21, %v557_v19  ;;  %v560_v24 = vld [vmem:[#allocation10 + $0x28] sm:$0xff]  ;;  %v561_v26 = vld [vmem:[#allocation10 + $0x30] sm:$0xff]  ;;  %v562_v27 = vld [vmem:[#allocation10 + $0x38] sm:$0xff] }
  0x6c   :  { %930 = vmatprep.subr.bf16.mxu1 %v929_v40  ;;  %v985_v25 = vpack.c.bf16 %v560_v24, %v559_v23  ;;  %v563_v29 = vld [vmem:[#allocation10 + $0x40] sm:$0xff]  ;;  %v564_v30 = vld [vmem:[#allocation10 + $0x48] sm:$0xff]  ;;  %v566_v37 = vld [vmem:[#allocation10 + $0x58] sm:$0xff] }
  0x6e   :  { %920 = vmatpush3.bf16.msra.mxu0 %v917_v28  ;;  %v989_v28 = vpack.c.bf16 %v562_v27, %v561_v26 }
  0x6f   :  { %922 = vmatprep.subr.bf16.mxu0 %v921_v31 }
  0x72   :  { %924 = vmatpush3.bf16.msra.mxu0 %v921_v31  ;;  %v993_v31 = vpack.c.bf16 %v564_v30, %v563_v29 }
  0x73   :  { %926 = vmatprep.subr.bf16.mxu0 %v925_v36 }
  0x76   :  { %928 = vmatpush3.bf16.msra.mxu0 %v925_v36  ;;  %v565_v36 = vld [vmem:[#allocation10 + $0x50] sm:$0xff] }
  0x77   :  { %954 = vmatprep.subr.bf16.mxu0 %v953_v62  ;;  %v997_v38 = vpack.c.bf16 %v566_v37, %v565_v36 }
 0x133   :  { %v757_v32 = vpop.f32.mrb[0].mxu0 }
 0x134   :  { %v166_v33 = vpop.f32.mrb[1].mxu0 }
 0x135   :  { %774 = vmatprep.mubr.msk.f32.mxu1 %vm183_vm1, %v166_v33 }
 0x136   :  { %775 = vmatmul.mubr.msk.f32.vlgmr.msra.gmra.mrb[0].mxu1 %vm183_vm1, %v757_v32 }
 0x137   :  { %932 = vmatpush3.bf16.msra.mxu1 %v929_v40 }
 0x138   :  { %934 = vmatprep.subr.bf16.mxu1 %v933_v42 }
 0x13b   :  { %936 = vmatpush3.bf16.msra.mxu1 %v933_v42 }
 0x13c   :  { %938 = vmatprep.subr.bf16.mxu1 %v937_v45 }
 0x13f   :  { %940 = vmatpush3.bf16.msra.mxu1 %v937_v45 }
 0x140   :  { %942 = vmatprep.subr.bf16.mxu1 %v941_v48 }
 0x143   :  { %944 = vmatpush3.bf16.msra.mxu1 %v941_v48 }
 0x144   :  { %946 = vmatprep.subr.bf16.mxu1 %v945_v51 }
 0x147   :  { %948 = vmatpush3.bf16.msra.mxu1 %v945_v51 }
 0x148   :  { %950 = vmatprep.subr.bf16.mxu1 %v949_v58 }
 0x14b   :  { %952 = vmatpush3.bf16.msra.mxu1 %v949_v58 }
 0x14c   :  { %978 = vmatprep.subr.bf16.mxu1 %v977_v20 }
 0x209   :  { %v776_v52 = vpop.f32.mrb[0].mxu1 }
 0x20a   :  { %v256_v53 = vpop.f32.mrb[1].mxu1  ;;  %v266_v55 = vmax.f32 %v776_v52, 0.0 }
 0x20b   :  { %v265_v54 = vmax.f32 %v256_v53, 0.0 }
 0x20d   :  { %801 = vmatprep.mubr.msk.f32.mxu0 %vm279_vm2, %v265_v54 }
 0x20e   :  { %802 = vmatmul.mubr.msk.f32.vlgmr.msra.gmra.mrb[2].mxu0 %vm279_vm2, %v266_v55 }
 0x20f   :  { %956 = vmatpush3.bf16.msra.mxu0 %v953_v62 }
 0x210   :  { %958 = vmatprep.subr.bf16.mxu0 %v957_v0 }
 0x213   :  { %960 = vmatpush3.bf16.msra.mxu0 %v957_v0 }
 0x214   :  { %962 = vmatprep.subr.bf16.mxu0 %v961_v3 }
 0x217   :  { %964 = vmatpush3.bf16.msra.mxu0 %v961_v3 }
 0x218   :  { %966 = vmatprep.subr.bf16.mxu0 %v965_v6 }
 0x21b   :  { %968 = vmatpush3.bf16.msra.mxu0 %v965_v6 }
 0x21c   :  { %970 = vmatprep.subr.bf16.mxu0 %v969_v9 }
 0x21f   :  { %972 = vmatpush3.bf16.msra.mxu0 %v969_v9 }
 0x220   :  { %974 = vmatprep.subr.bf16.mxu0 %v973_v16 }
 0x223   :  { %976 = vmatpush3.bf16.msra.mxu0 %v973_v16 }
 0x2e1   :  { %v803_v10 = vpop.f32.mrb[2].mxu0 }
 0x2e2   :  { %v352_v11 = vpop.f32.mrb[3].mxu0  ;;  %v362_v13 = vmax.f32 %v803_v10, 0.0 }
 0x2e3   :  { %v361_v12 = vmax.f32 %v352_v11, 0.0 }
 0x2e5   :  { %828 = vmatprep.mubr.msk.f32.mxu1 %vm279_vm2, %v361_v12 }
 0x2e6   :  { %829 = vmatmul.mubr.msk.f32.vlgmr.msra.gmra.mrb[2].mxu1 %vm279_vm2, %v362_v13 }
 0x2e7   :  { %980 = vmatpush3.bf16.msra.mxu1 %v977_v20 }
 0x2e8   :  { %982 = vmatprep.subr.bf16.mxu1 %v981_v22 }
 0x2eb   :  { %984 = vmatpush3.bf16.msra.mxu1 %v981_v22 }
 0x2ec   :  { %986 = vmatprep.subr.bf16.mxu1 %v985_v25 }
 0x2ef   :  { %988 = vmatpush3.bf16.msra.mxu1 %v985_v25 }
 0x2f0   :  { %990 = vmatprep.subr.bf16.mxu1 %v989_v28 }
 0x2f3   :  { %992 = vmatpush3.bf16.msra.mxu1 %v989_v28 }
 0x2f4   :  { %994 = vmatprep.subr.bf16.mxu1 %v993_v31 }
 0x2f7   :  { %996 = vmatpush3.bf16.msra.mxu1 %v993_v31 }
 0x2f8   :  { %998 = vmatprep.subr.bf16.mxu1 %v997_v38 }
 0x2fb   :  { %1000 = vmatpush3.bf16.msra.mxu1 %v997_v38 }
 0x3b9   :  { %v830_v32 = vpop.f32.mrb[2].mxu1 }
 0x3ba   :  { %v448_v33 = vpop.f32.mrb[3].mxu1  ;;  %v458_v35 = vmax.f32 %v830_v32, 0.0 }
 0x3bb   :  { %v457_v34 = vmax.f32 %v448_v33, 0.0 }
 0x3bd   :  { %855 = vmatprep.mubr.msk.f32.mxu0 %vm279_vm2, %v457_v34 }
 0x3be   :  { %856 = vmatmul.mubr.msk.f32.vlgmr.msra.gmra.mrb[4].mxu0 %vm279_vm2, %v458_v35 }
 0x491   :  { %v857_v39 = vpop.f32.mrb[4].mxu0 }
 0x492   :  { %v544_v40 = vpop.f32.mrb[5].mxu0  ;;  %v554_v42 = vmax.f32 %v857_v39, 0.0 }
 0x493   :  { %v553_v41 = vmax.f32 %v544_v40, 0.0 }
 0x495   :  { %882 = vmatprep.mubr.msk.f32.mxu1 %vm279_vm2, %v553_v41 }
 0x496   :  { %883 = vmatmul.mubr.msk.f32.vlgmr.msra.gmra.mrb[4].mxu1 %vm279_vm2, %v554_v42 }
 0x569   :  { %v884_v43 = vpop.f32.mrb[4].mxu1 }
 0x56a   :  { %649 = vst.msk [vmem:[#allocation11 + $0x8] sm:$0xff] %vm279_vm2, %v884_v43  ;;  %v639_v44 = vpop.f32.mrb[5].mxu1 }
 0x56b   :  { %648 = vst.msk [vmem:[#allocation11] sm:$0xff] %vm279_vm2, %v639_v44 }
 0x56c   :  { %1130 = shalt.err (!%p1127_p2)
}
 0x56d   :  { %s1131_s7 = scalar_lea.hbm %s1308_s5, 256 }
 0x56e   :  { %p1132_p3 = scmp.ne.s32.totalorder %s1308_s5, %s1131_s7  ;;  %p1135_p4 = scmp.lt.u32.totalorder %s1131_s7, %s1308_s5 }
 0x570   :  { %p1137_p5 = pnand %p1135_p4, %p1132_p3 }
 0x572   :  { %1140 = shalt.err (!%p1137_p5)
}
 0x573   :  { %661 = dma.vmem_to_hbm [thread:$0]  %s656_s28, 256, %s1308_s5, [#allocation4], %s1151_s30, %s1151_s30, %s1152_s6  }
 0x574   :  { %1147 = dma.done.wait [#allocation4], 256  }
 0x575   :  { %1148 = vsyncadd [#allocation4], 4294967040 }
 0x576   :  { %665 = vsyncpa [#allocation3], 1 }
 0x577   :  { %666 = vsyncpa [#allocation6], 1 }
 0x578   :  { %667 = vsyncpa [#allocation9], 1 }
 0x579   :  { %668 = vsyncpa [#allocation4], 1 }

</bundles_post_ra>
